<compile_context>
chip_gen: v5e
topology: v5e:2x2
jax: 0.10.0
libtpu: 0.0.40
codegen_flags: <defaults>
</compile_context>

<pallas_src>
import jax
import jax.numpy as jnp
import numpy as np
from jax.experimental import pallas as pl
from jax.experimental.pallas import tpu as pltpu

LANES = 128      # lane width: hidden padding + batch packing granule
HPAD = 128       # hidden / fc3-weight feature dim padded to one lane tile
MIN_TB = 512     # never shrink a batch tile below this (per-step overhead)
MAX_TB = 4096    # cap tile rows (VMEM / pipelining granularity)


# ----------------------------------------------------------------------------
# Fused 3-layer MLP kernel.  One grid step processes a (TB, *) batch tile; all
# (padded) weights/biases are small grid-invariant full blocks resident in
# VMEM.  The output block is a single lane-dense (1, 1, TB) row of Q values.
# ----------------------------------------------------------------------------
def critic_kernel(s_ref, a_ref, w1s_ref, w1a_ref, b1_ref,
                  w2_ref, b2_ref, w3_ref, b3_ref, o_ref):
    # fc1 on the split inputs:  cat(s, a) @ W1  ==  s @ W1_s + a @ W1_a
    h1 = jnp.dot(s_ref[...], w1s_ref[...], preferred_element_type=jnp.float32)
    h1 = h1 + jnp.dot(a_ref[...], w1a_ref[...], preferred_element_type=jnp.float32)
    h1 = jnp.maximum(h1 + b1_ref[...], 0.0)                      # ReLU, (TB, HPAD)

    h2 = jnp.dot(h1, w2_ref[...], preferred_element_type=jnp.float32) + b2_ref[...]
    h2 = jnp.maximum(h2, 0.0)                                     # ReLU, (TB, HPAD)

    # fc3, packed lane-dense:  w3_row (1,H) @ h2^T (H,TB) -> (1, TB) Q row.
    # Only TB*4 bytes of output per tile are written back to HBM.
    q_row = (jnp.dot(w3_ref[...], h2.T, preferred_element_type=jnp.float32)
             + b3_ref[...])                                       # (1, TB)
    o_ref[0] = q_row.astype(o_ref.dtype)                          # block (1, 1, TB)


# ----------------------------------------------------------------------------
# Tiling / wrapper.
# ----------------------------------------------------------------------------
def _round_up(x, m):
    return (x + m - 1) // m * m


def _choose_tiling(batch):
    """Pick (n_tiles, tile_rows): tiles are multiples of 128 rows, capped at
    MAX_TB, never below MIN_TB, and >= 4 tiles when the batch is big enough so
    v7x's two TensorCores each get >= 2 pipelined steps."""
    bp = _round_up(max(batch, 1), LANES)
    n_tiles = max(1, pl.cdiv(bp, MAX_TB), min(4, bp // MIN_TB))
    tb = _round_up(pl.cdiv(bp, n_tiles), LANES)
    n_tiles = pl.cdiv(bp, tb)
    return n_tiles, tb


def critic_forward(state, action, padded_params):
    """JAX wrapper: batch-tiled pallas_call over the fused MLP.  Returns (B,1)."""
    w1s, w1a, b1, w2, b2, w3, b3 = padded_params
    state = state.astype(jnp.float32)
    action = action.astype(jnp.float32)
    B, S = state.shape
    A = action.shape[1]

    n_tiles, tb = _choose_tiling(B)
    Bp = n_tiles * tb
    if Bp != B:  # zero rows are harmless; their Q values are sliced off below
        state = jnp.pad(state, ((0, Bp - B), (0, 0)))
        action = jnp.pad(action, ((0, Bp - B), (0, 0)))

    row_spec = lambda cols: pl.BlockSpec((tb, cols), lambda i: (i, 0))
    full_spec = lambda arr: pl.BlockSpec(arr.shape, lambda i: (0,) * arr.ndim)

    out = pl.pallas_call(
        critic_kernel,
        out_shape=jax.ShapeDtypeStruct((n_tiles, 1, tb), jnp.float32),
        grid=(n_tiles,),
        in_specs=[
            row_spec(S),            # state tile   (TB, S)
            row_spec(A),            # action tile  (TB, A)
            full_spec(w1s), full_spec(w1a), full_spec(b1),
            full_spec(w2), full_spec(b2),
            full_spec(w3), full_spec(b3),
        ],
        out_specs=pl.BlockSpec((1, 1, tb), lambda i: (i, 0, 0)),   # packed Q row
        compiler_params=pltpu.CompilerParams(
            dimension_semantics=("parallel",)),
    )(state, action, w1s, w1a, b1, w2, b2, w3, b3)

    # Packed rows are in batch order: flatten, drop padded rows, return (B, 1).
    return out.reshape(-1)[:B][:, None]


# ----------------------------------------------------------------------------
# Parameter init mirroring Critic.__init__ / reset_parameters.
# PyTorch weight is [out, in]; hidden_init uses weight.size()[0] = out, so
# lim = 1/sqrt(hidden_size) for fc1/fc2 and fc3 uses +/-0.003.  Biases keep
# nn.Linear's default uniform(-1/sqrt(fan_in), 1/sqrt(fan_in)).
# Weights are stored as [in, out] for the kernel (x @ W + b).
# ----------------------------------------------------------------------------
def init_critic_params(key, state_size, action_size, hidden_size=32):
    in_dim = state_size + action_size
    k = jax.random.split(key, 6)

    lim12 = 1.0 / np.sqrt(hidden_size)
    w1 = jax.random.uniform(k[0], (in_dim, hidden_size), jnp.float32, -lim12, lim12)
    w2 = jax.random.uniform(k[1], (hidden_size, hidden_size), jnp.float32, -lim12, lim12)
    w3 = jax.random.uniform(k[2], (hidden_size, 1), jnp.float32, -0.003, 0.003)

    b1_lim = 1.0 / np.sqrt(in_dim)
    b2_lim = 1.0 / np.sqrt(hidden_size)
    b3_lim = 1.0 / np.sqrt(hidden_size)
    b1 = jax.random.uniform(k[3], (1, hidden_size), jnp.float32, -b1_lim, b1_lim)
    b2 = jax.random.uniform(k[4], (1, hidden_size), jnp.float32, -b2_lim, b2_lim)
    b3 = jax.random.uniform(k[5], (1, 1), jnp.float32, -b3_lim, b3_lim)

    return (w1, b1, w2, b2, w3, b3)


def pad_params_for_kernel(params, state_size, action_size):
    """Split fc1 along the (state|action) input rows, zero-pad the hidden dim
    to HPAD lanes, and store fc3's weight as a (1, HPAD) row for the packed
    output matmul.  Zero padding is exact (no-op through matmul + ReLU)."""
    w1, b1, w2, b2, w3, b3 = params

    def padcols(x):
        return jnp.pad(x, ((0, 0), (0, HPAD - x.shape[1])))

    w1s = padcols(w1[:state_size, :])                               # (S, HPAD)
    w1a = padcols(w1[state_size:, :])                               # (A, HPAD)
    b1p = padcols(b1)                                               # (1, HPAD)
    w2p = jnp.pad(w2, ((0, HPAD - w2.shape[0]), (0, HPAD - w2.shape[1])))  # (HPAD, HPAD)
    b2p = padcols(b2)                                               # (1, HPAD)
    w3r = padcols(w3.T)                                             # (1, HPAD) row form
    b3s = b3.reshape(1, 1)                                          # (1, 1) scalar
    return (w1s, w1a, b1p, w2p, b2p, w3r, b3s)


# Pure-JAX reference (unpadded) for a correctness sanity check.
def critic_ref(state, action, params):
    w1, b1, w2, b2, w3, b3 = params
    x = jnp.concatenate([state, action], axis=-1).astype(jnp.float32)
    h1 = jnp.maximum(x @ w1 + b1, 0.0)
    h2 = jnp.maximum(h1 @ w2 + b2, 0.0)
    return h2 @ w3 + b3


if __name__ == "__main__":
    state_size, action_size, hidden_size = 8, 4, 32

    key = jax.random.PRNGKey(0)
    k_params, k_s1, k_a1, k_s2, k_a2 = jax.random.split(key, 5)

    params = init_critic_params(k_params, state_size, action_size, hidden_size)
    padded = pad_params_for_kernel(params, state_size, action_size)

    # Small case from the module spec (batch=2) -> single 128-row tile.
    s1 = jax.random.normal(k_s1, (2, state_size), jnp.float32)
    a1 = jax.random.normal(k_a1, (2, action_size), jnp.float32)
    q1 = jax.block_until_ready(critic_forward(s1, a1, padded))
    np.testing.assert_allclose(np.asarray(q1), np.asarray(critic_ref(s1, a1, params)),
                               rtol=1e-4, atol=1e-5)

    # Larger, non-aligned batch -> multi-tile grid + batch-padding path.
    s2 = jax.random.normal(k_s2, (2049, state_size), jnp.float32)
    a2 = jax.random.normal(k_a2, (2049, action_size), jnp.float32)
    q2 = jax.block_until_ready(critic_forward(s2, a2, padded))
    np.testing.assert_allclose(np.asarray(q2), np.asarray(critic_ref(s2, a2, params)),
                               rtol=1e-4, atol=1e-5)

    print("KERNEL_OK")
</pallas_src>

<mosaic_0001>
module attributes {stable_mosaic.version = 11 : i64} {
  func.func @critic_kernel(%arg0: i32, %arg1: memref<128x8xf32, #tpu.memory_space<vmem>>, %arg2: memref<128x4xf32, #tpu.memory_space<vmem>>, %arg3: memref<8x128xf32, #tpu.memory_space<vmem>>, %arg4: memref<4x128xf32, #tpu.memory_space<vmem>>, %arg5: memref<1x128xf32, #tpu.memory_space<vmem>>, %arg6: memref<128x128xf32, #tpu.memory_space<vmem>>, %arg7: memref<1x128xf32, #tpu.memory_space<vmem>>, %arg8: memref<1x128xf32, #tpu.memory_space<vmem>>, %arg9: memref<1x1xf32, #tpu.memory_space<vmem>>, %arg10: memref<1x1x128xf32, #tpu.memory_space<vmem>>) attributes {dimension_semantics = [#tpu.dimension_semantics<parallel>], iteration_bounds = array<i64: 1>, scalar_prefetch = 0 : i64, scratch_operands = 0 : i64, tpu.core_type = #tpu.core_type<tc>, window_params = [{transform_indices = @transform_0, window_bounds = array<i64: 128, 8>}, {transform_indices = @transform_1, window_bounds = array<i64: 128, 4>}, {pipeline_mode = #tpu.pipeline_mode<synchronous>, transform_indices = @transform_2, window_bounds = array<i64: 8, 128>}, {pipeline_mode = #tpu.pipeline_mode<synchronous>, transform_indices = @transform_3, window_bounds = array<i64: 4, 128>}, {pipeline_mode = #tpu.pipeline_mode<synchronous>, transform_indices = @transform_4, window_bounds = array<i64: 1, 128>}, {pipeline_mode = #tpu.pipeline_mode<synchronous>, transform_indices = @transform_5, window_bounds = array<i64: 128, 128>}, {pipeline_mode = #tpu.pipeline_mode<synchronous>, transform_indices = @transform_6, window_bounds = array<i64: 1, 128>}, {pipeline_mode = #tpu.pipeline_mode<synchronous>, transform_indices = @transform_7, window_bounds = array<i64: 1, 128>}, {pipeline_mode = #tpu.pipeline_mode<synchronous>, transform_indices = @transform_8, window_bounds = array<i64: 1, 1>}, {transform_indices = @transform_9, window_bounds = array<i64: 1, 1, 128>}]} {
    %c0 = arith.constant 0 : index
    %c0_0 = arith.constant 0 : index
    %0 = vector.load %arg1[%c0, %c0_0] : memref<128x8xf32, #tpu.memory_space<vmem>>, vector<128x8xf32>
    %c0_1 = arith.constant 0 : index
    %c0_2 = arith.constant 0 : index
    %1 = vector.load %arg3[%c0_1, %c0_2] : memref<8x128xf32, #tpu.memory_space<vmem>>, vector<8x128xf32>
    %cst = arith.constant dense<0.000000e+00> : vector<128x128xf32>
    %2 = tpu.matmul %0, %1, %cst {dimension_numbers = #tpu.dot_dimension_numbers<[1], [0], [0], [1], [0, 0, 1, 1], [], []>} : vector<128x8xf32>, vector<8x128xf32>, vector<128x128xf32> -> vector<128x128xf32>
    %c0_3 = arith.constant 0 : index
    %c0_4 = arith.constant 0 : index
    %3 = vector.load %arg2[%c0_3, %c0_4] : memref<128x4xf32, #tpu.memory_space<vmem>>, vector<128x4xf32>
    %c0_5 = arith.constant 0 : index
    %c0_6 = arith.constant 0 : index
    %4 = vector.load %arg4[%c0_5, %c0_6] : memref<4x128xf32, #tpu.memory_space<vmem>>, vector<4x128xf32>
    %cst_7 = arith.constant dense<0.000000e+00> : vector<128x128xf32>
    %5 = tpu.matmul %3, %4, %cst_7 {dimension_numbers = #tpu.dot_dimension_numbers<[1], [0], [0], [1], [0, 0, 1, 1], [], []>} : vector<128x4xf32>, vector<4x128xf32>, vector<128x128xf32> -> vector<128x128xf32>
    %6 = arith.addf %2, %5 : vector<128x128xf32>
    %c0_8 = arith.constant 0 : index
    %c0_9 = arith.constant 0 : index
    %7 = vector.load %arg5[%c0_8, %c0_9] : memref<1x128xf32, #tpu.memory_space<vmem>>, vector<1x128xf32>
    %8 = vector.broadcast %7 : vector<1x128xf32> to vector<128x128xf32>
    %9 = arith.addf %6, %8 : vector<128x128xf32>
    %cst_10 = arith.constant 0.000000e+00 : f32
    %10 = vector.broadcast %cst_10 : f32 to vector<128x128xf32>
    %11 = arith.maximumf %9, %10 : vector<128x128xf32>
    %c0_11 = arith.constant 0 : index
    %c0_12 = arith.constant 0 : index
    %12 = vector.load %arg6[%c0_11, %c0_12] : memref<128x128xf32, #tpu.memory_space<vmem>>, vector<128x128xf32>
    %cst_13 = arith.constant dense<0.000000e+00> : vector<128x128xf32>
    %13 = tpu.matmul %11, %12, %cst_13 {dimension_numbers = #tpu.dot_dimension_numbers<[1], [0], [0], [1], [0, 0, 1, 1], [], []>} : vector<128x128xf32>, vector<128x128xf32>, vector<128x128xf32> -> vector<128x128xf32>
    %c0_14 = arith.constant 0 : index
    %c0_15 = arith.constant 0 : index
    %14 = vector.load %arg7[%c0_14, %c0_15] : memref<1x128xf32, #tpu.memory_space<vmem>>, vector<1x128xf32>
    %15 = vector.broadcast %14 : vector<1x128xf32> to vector<128x128xf32>
    %16 = arith.addf %13, %15 : vector<128x128xf32>
    %cst_16 = arith.constant 0.000000e+00 : f32
    %17 = vector.broadcast %cst_16 : f32 to vector<128x128xf32>
    %18 = arith.maximumf %16, %17 : vector<128x128xf32>
    %c0_17 = arith.constant 0 : index
    %c0_18 = arith.constant 0 : index
    %19 = vector.load %arg8[%c0_17, %c0_18] : memref<1x128xf32, #tpu.memory_space<vmem>>, vector<1x128xf32>
    %20 = tpu.transpose %18, [1, 0] : vector<128x128xf32> -> vector<128x128xf32>
    %cst_19 = arith.constant dense<0.000000e+00> : vector<1x128xf32>
    %21 = tpu.matmul %19, %20, %cst_19 {dimension_numbers = #tpu.dot_dimension_numbers<[1], [0], [0], [1], [0, 0, 1, 1], [], []>} : vector<1x128xf32>, vector<128x128xf32>, vector<1x128xf32> -> vector<1x128xf32>
    %c0_20 = arith.constant 0 : index
    %c0_21 = arith.constant 0 : index
    %22 = vector.load %arg9[%c0_20, %c0_21] : memref<1x1xf32, #tpu.memory_space<vmem>>, vector<1x1xf32>
    %23 = vector.broadcast %22 : vector<1x1xf32> to vector<1x128xf32>
    %24 = arith.addf %21, %23 : vector<1x128xf32>
    %c0_22 = arith.constant 0 : index
    %c0_23 = arith.constant 0 : index
    %c0_24 = arith.constant 0 : index
    %25 = vector.load %arg10[%c0_22, %c0_23, %c0_24] : memref<1x1x128xf32, #tpu.memory_space<vmem>>, vector<1x1x128xf32>
    %26 = vector.shape_cast %25 : vector<1x1x128xf32> to vector<1x128xf32>
    %27 = vector.shape_cast %24 : vector<1x128xf32> to vector<1x1x128xf32>
    tpu.vector_store %arg10[%c0_22, %c0_23, %c0_24], %27 {strides = array<i32>} : memref<1x1x128xf32, #tpu.memory_space<vmem>>, vector<1x1x128xf32>,
    return
  }
  func.func @transform_0(%arg0: i32) -> (i32, i32) {
    %c0_i32 = arith.constant 0 : i32
    %c0_i32_0 = arith.constant 0 : i32
    return %arg0, %c0_i32 : i32, i32
  }
  func.func @transform_1(%arg0: i32) -> (i32, i32) {
    %c0_i32 = arith.constant 0 : i32
    %c0_i32_0 = arith.constant 0 : i32
    return %arg0, %c0_i32 : i32, i32
  }
  func.func @transform_2(%arg0: i32) -> (i32, i32) {
    %c0_i32 = arith.constant 0 : i32
    %c0_i32_0 = arith.constant 0 : i32
    %c0_i32_1 = arith.constant 0 : i32
    return %c0_i32, %c0_i32_0 : i32, i32
  }
  func.func @transform_3(%arg0: i32) -> (i32, i32) {
    %c0_i32 = arith.constant 0 : i32
    %c0_i32_0 = arith.constant 0 : i32
    %c0_i32_1 = arith.constant 0 : i32
    return %c0_i32, %c0_i32_0 : i32, i32
  }
  func.func @transform_4(%arg0: i32) -> (i32, i32) {
    %c0_i32 = arith.constant 0 : i32
    %c0_i32_0 = arith.constant 0 : i32
    %c0_i32_1 = arith.constant 0 : i32
    return %c0_i32, %c0_i32_0 : i32, i32
  }
  func.func @transform_5(%arg0: i32) -> (i32, i32) {
    %c0_i32 = arith.constant 0 : i32
    %c0_i32_0 = arith.constant 0 : i32
    %c0_i32_1 = arith.constant 0 : i32
    return %c0_i32, %c0_i32_0 : i32, i32
  }
  func.func @transform_6(%arg0: i32) -> (i32, i32) {
    %c0_i32 = arith.constant 0 : i32
    %c0_i32_0 = arith.constant 0 : i32
    %c0_i32_1 = arith.constant 0 : i32
    return %c0_i32, %c0_i32_0 : i32, i32
  }
  func.func @transform_7(%arg0: i32) -> (i32, i32) {
    %c0_i32 = arith.constant 0 : i32
    %c0_i32_0 = arith.constant 0 : i32
    %c0_i32_1 = arith.constant 0 : i32
    return %c0_i32, %c0_i32_0 : i32, i32
  }
  func.func @transform_8(%arg0: i32) -> (i32, i32) {
    %c0_i32 = arith.constant 0 : i32
    %c0_i32_0 = arith.constant 0 : i32
    %c0_i32_1 = arith.constant 0 : i32
    return %c0_i32, %c0_i32_0 : i32, i32
  }
  func.func @transform_9(%arg0: i32) -> (i32, i32, i32) {
    %c0_i32 = arith.constant 0 : i32
    %c0_i32_0 = arith.constant 0 : i32
    %c0_i32_1 = arith.constant 0 : i32
    return %arg0, %c0_i32, %c0_i32_0 : i32, i32, i32
  }
}

</mosaic_0001>

<bundles_post_ra>
// kernel: tpu_custom_call.1
= control target key start
LH: loop header
LB: loop body
LE: loop exit
PB: predicated region body
PF: predicated region fallthrough
CT: control target
= control target key end

     0   :  { %s817_s0 = inlined_call_operand.vmem [shape: f32[128,8], index: 0, kind: input, shape index: {}]   ;;  %s818_s1 = inlined_call_operand.vmem [shape: f32[128,4], index: 1, kind: input, shape index: {}]   ;;  %s819_s2 = inlined_call_operand.vmem [shape: f32[8,128], index: 2, kind: input, shape index: {}]   ;;  %s820_s3 = inlined_call_operand.vmem [shape: f32[4,128], index: 3, kind: input, shape index: {}]   ;;  %s821_s4 = inlined_call_operand.vmem [shape: f32[1,128], index: 4, kind: input, shape index: {}]   ;;  %s822_s5 = inlined_call_operand.vmem [shape: f32[128,128], index: 5, kind: input, shape index: {}]   ;;  %s823_s6 = inlined_call_operand.vmem [shape: f32[1,128], index: 6, kind: input, shape index: {}]   ;;  %s824_s7 = inlined_call_operand.vmem [shape: f32[1,128], index: 7, kind: input, shape index: {}]   ;;  %s825_s8 = inlined_call_operand.<no memory space> [shape: f32[1,1], index: 8, kind: input, shape index: {}]   ;;  %s826_s9 = inlined_call_operand.hbm [shape: f32[1,1,128], index: 9, kind: output, shape index: {}]  }
   0x1   :  { %v14_v0 = vstv %s825_s8 }
   0x2   :  { %15 = vst [vmem:[#allocation2] sm:$0x1] %v14_v0 }
   0x3   :  { %v68_v1 = vld [vmem:[%s820_s3] sm:$0xf]  ;;  %vm118_vm0 = vcmask 1043456   ;;  %vm69_vm1 = vcmask 31744   ;;  %vm187_vm2 = vcmask 64512  }
   0x4   :  { %v51_v2 = vld [vmem:[%s819_s2] sm:$0xff]  ;;  %483 = vmatpush.msk.msra.mxu0 %vm118_vm0, %v68_v1 }
   0x5   :  { %v52_v3 = vld [vmem:[%s818_s1] sm:$0xff]  ;;  %251 = vmatpush.msra.mxu1 %v51_v2 }
   0x6   :  { %v35_v4 = vld [vmem:[%s817_s0] sm:$0xff]  ;;  %484 = vmatmul.msk.f32.vlgmr.msra.gmra.mxu0 %vm69_vm1, %v52_v3 }
   0x7   :  { %500 = vmatmul.msk.f32.vlgmr.msra.gmra.mxu1 %vm187_vm2, %v35_v4 }
   0x8   :  { %16 = vsyncpa [#allocation4], 0  ;;  %v53_v5 = vld [vmem:[%s818_s1 + $0x8] sm:$0xff]  ;;  %v54_v7 = vld [vmem:[%s818_s1 + $0x10] sm:$0xff]  ;;  %s548_s16 = smov [#allocation3]   ;;  %s474_s8 = sshll.u32 %s826_s9, 4  ;;  %s475_s8 = int_to_ptr.hbm [resolvable:$true] %s474_s8 }
   0x9   :  { %v36_v6 = vld [vmem:[%s817_s0 + $0x8] sm:$0xff]  ;;  %v37_v8 = vld [vmem:[%s817_s0 + $0x10] sm:$0xff]  ;;  %v55_v9 = vld [vmem:[%s818_s1 + $0x18] sm:$0xff]  ;;  %s472_s17 = sshll.u32 %s548_s16, 4  ;;  %s473_s17 = int_to_ptr.vmem [resolvable:$true] %s472_s17 }
   0xa   :  { %v38_v10 = vld [vmem:[%s817_s0 + $0x18] sm:$0xff]  ;;  %v56_v11 = vld [vmem:[%s818_s1 + $0x20] sm:$0xff]  ;;  %v57_v13 = vld [vmem:[%s818_s1 + $0x28] sm:$0xff] }
   0xb   :  { %v39_v12 = vld [vmem:[%s817_s0 + $0x20] sm:$0xff]  ;;  %v40_v14 = vld [vmem:[%s817_s0 + $0x28] sm:$0xff]  ;;  %v58_v15 = vld [vmem:[%s818_s1 + $0x30] sm:$0xff] }
   0xc   :  { %v41_v16 = vld [vmem:[%s817_s0 + $0x30] sm:$0xff]  ;;  %v59_v17 = vld [vmem:[%s818_s1 + $0x38] sm:$0xff]  ;;  %v60_v19 = vld [vmem:[%s818_s1 + $0x40] sm:$0xff] }
   0xd   :  { %v42_v18 = vld [vmem:[%s817_s0 + $0x38] sm:$0xff]  ;;  %v43_v20 = vld [vmem:[%s817_s0 + $0x40] sm:$0xff]  ;;  %v351_v22 = vld [vmem:[%s822_s5 + $0x70] sm:$0xff] }
   0xe   :  { %485 = vmatmul.msk.f32.gmra.mxu0 %vm69_vm1, %v53_v5  ;;  %v352_v21 = vld [vmem:[%s822_s5 + $0x78] sm:$0xff]  ;;  %v61_v23 = vld [vmem:[%s818_s1 + $0x48] sm:$0xff]  ;;  %v349_v26 = vld [vmem:[%s822_s5 + $0x60] sm:$0xff] }
   0xf   :  { %501 = vmatmul.msk.f32.gmra.mxu1 %vm187_vm2, %v36_v6  ;;  %357 = vmatpush.msra.mxu2 %v352_v21  ;;  %v44_v24 = vld [vmem:[%s817_s0 + $0x48] sm:$0xff]  ;;  %v348_v27 = vld [vmem:[%s822_s5 + $0x58] sm:$0xff]  ;;  %v347_v28 = vld [vmem:[%s822_s5 + $0x50] sm:$0xff] }
  0x10   :  { %v350_v25 = vld [vmem:[%s822_s5 + $0x68] sm:$0xff]  ;;  %v62_v29 = vld [vmem:[%s818_s1 + $0x50] sm:$0xff]  ;;  %v345_v32 = vld [vmem:[%s822_s5 + $0x40] sm:$0xff] }
  0x11   :  { %358 = vmatpush.msra.mxu2 %v351_v22  ;;  %v45_v30 = vld [vmem:[%s817_s0 + $0x50] sm:$0xff]  ;;  %v346_v31 = vld [vmem:[%s822_s5 + $0x48] sm:$0xff]  ;;  %v344_v33 = vld [vmem:[%s822_s5 + $0x38] sm:$0xff] }
  0x12   :  { %v343_v34 = vld [vmem:[%s822_s5 + $0x30] sm:$0xff]  ;;  %v63_v35 = vld [vmem:[%s818_s1 + $0x58] sm:$0xff]  ;;  %v342_v37 = vld [vmem:[%s822_s5 + $0x28] sm:$0xff] }
  0x13   :  { %359 = vmatpush.msra.mxu2 %v350_v25  ;;  %v46_v36 = vld [vmem:[%s817_s0 + $0x58] sm:$0xff]  ;;  %v341_v38 = vld [vmem:[%s822_s5 + $0x20] sm:$0xff]  ;;  %v339_v42 = vld [vmem:[%s822_s5 + $0x10] sm:$0xff] }
  0x14   :  { %v340_v39 = vld [vmem:[%s822_s5 + $0x18] sm:$0xff]  ;;  %v64_v40 = vld [vmem:[%s818_s1 + $0x60] sm:$0xff]  ;;  %v338_v43 = vld [vmem:[%s822_s5 + $0x8] sm:$0xff] }
  0x15   :  { %360 = vmatpush.msra.mxu2 %v349_v26  ;;  %v47_v41 = vld [vmem:[%s817_s0 + $0x60] sm:$0xff]  ;;  %v65_v45 = vld [vmem:[%s818_s1 + $0x68] sm:$0xff]  ;;  %v66_v47 = vld [vmem:[%s818_s1 + $0x70] sm:$0xff] }
  0x16   :  { %486 = vmatmul.msk.f32.gmra.mxu0 %vm69_vm1, %v54_v7  ;;  %v337_v44 = vld [vmem:[%s822_s5] sm:$0xff]  ;;  %v48_v46 = vld [vmem:[%s817_s0 + $0x68] sm:$0xff]  ;;  %v49_v48 = vld [vmem:[%s817_s0 + $0x70] sm:$0xff] }
  0x17   :  { %502 = vmatmul.msk.f32.gmra.mxu1 %vm187_vm2, %v37_v8  ;;  %361 = vmatpush.msra.mxu2 %v348_v27  ;;  %v67_v49 = vld [vmem:[%s818_s1 + $0x78] sm:$0xff]  ;;  %v787_v51 = vld [vmem:[%s821_s4] ss:$0 sm:$0xff] }
  0x18   :  { %v50_v50 = vld [vmem:[%s817_s0 + $0x78] sm:$0xff] }
  0x19   :  { %362 = vmatpush.msra.mxu2 %v347_v28 }
  0x1b   :  { %363 = vmatpush.msra.mxu2 %v346_v31 }
  0x1d   :  { %364 = vmatpush.msra.mxu2 %v345_v32 }
  0x1e   :  { %487 = vmatmul.msk.f32.gmra.mxu0 %vm69_vm1, %v55_v9 }
  0x1f   :  { %503 = vmatmul.msk.f32.gmra.mxu1 %vm187_vm2, %v38_v10  ;;  %365 = vmatpush.msra.mxu2 %v344_v33 }
  0x21   :  { %366 = vmatpush.msra.mxu2 %v343_v34 }
  0x23   :  { %367 = vmatpush.msra.mxu2 %v342_v37 }
  0x25   :  { %368 = vmatpush.msra.mxu2 %v341_v38 }
  0x26   :  { %488 = vmatmul.msk.f32.gmra.mxu0 %vm69_vm1, %v56_v11 }
  0x27   :  { %504 = vmatmul.msk.f32.gmra.mxu1 %vm187_vm2, %v39_v12  ;;  %369 = vmatpush.msra.mxu2 %v340_v39 }
  0x29   :  { %370 = vmatpush.msra.mxu2 %v339_v42 }
  0x2b   :  { %371 = vmatpush.msra.mxu2 %v338_v43 }
  0x2d   :  { %372 = vmatpush.msra.mxu2 %v337_v44 }
  0x2e   :  { %489 = vmatmul.msk.f32.gmra.mxu0 %vm69_vm1, %v57_v13 }
  0x2f   :  { %505 = vmatmul.msk.f32.gmra.mxu1 %vm187_vm2, %v40_v14 }
  0x36   :  { %490 = vmatmul.msk.f32.gmra.mxu0 %vm69_vm1, %v58_v15 }
  0x37   :  { %506 = vmatmul.msk.f32.gmra.mxu1 %vm187_vm2, %v41_v16 }
  0x3e   :  { %491 = vmatmul.msk.f32.gmra.mxu0 %vm69_vm1, %v59_v17 }
  0x3f   :  { %507 = vmatmul.msk.f32.gmra.mxu1 %vm187_vm2, %v42_v18 }
  0x46   :  { %492 = vmatmul.msk.f32.gmra.mxu0 %vm69_vm1, %v60_v19 }
  0x47   :  { %508 = vmatmul.msk.f32.gmra.mxu1 %vm187_vm2, %v43_v20 }
  0x4e   :  { %493 = vmatmul.msk.f32.gmra.mxu0 %vm69_vm1, %v61_v23 }
  0x4f   :  { %509 = vmatmul.msk.f32.gmra.mxu1 %vm187_vm2, %v44_v24 }
  0x56   :  { %494 = vmatmul.msk.f32.gmra.mxu0 %vm69_vm1, %v62_v29 }
  0x57   :  { %510 = vmatmul.msk.f32.gmra.mxu1 %vm187_vm2, %v45_v30 }
  0x5e   :  { %495 = vmatmul.msk.f32.gmra.mxu0 %vm69_vm1, %v63_v35 }
  0x5f   :  { %511 = vmatmul.msk.f32.gmra.mxu1 %vm187_vm2, %v46_v36 }
  0x66   :  { %496 = vmatmul.msk.f32.gmra.mxu0 %vm69_vm1, %v64_v40 }
  0x67   :  { %512 = vmatmul.msk.f32.gmra.mxu1 %vm187_vm2, %v47_v41 }
  0x6e   :  { %497 = vmatmul.msk.f32.gmra.mxu0 %vm69_vm1, %v65_v45 }
  0x6f   :  { %513 = vmatmul.msk.f32.gmra.mxu1 %vm187_vm2, %v48_v46 }
  0x76   :  { %498 = vmatmul.msk.f32.gmra.mxu0 %vm69_vm1, %v66_v47 }
  0x77   :  { %514 = vmatmul.msk.f32.gmra.mxu1 %vm187_vm2, %v49_v48 }
  0x7e   :  { %499 = vmatmul.msk.f32.gmra.mxu0 %vm69_vm1, %v67_v49 }
  0x7f   :  { %515 = vmatmul.msk.f32.gmra.mxu1 %vm187_vm2, %v50_v50 }
  0x83   :  { %v139_v52 = vpop.f32.mrf.mxu0 }
  0x84   :  { %v253_v53 = vpop.f32.mrf.mxu1 }
  0x85   :  { %v254_v54 = vadd.f32 %v253_v53, %v139_v52 }
  0x87   :  { %v305_v55 = vadd.f32 %v787_v51, %v254_v54 }
  0x89   :  { %v321_v56 = vmax.f32 %v305_v55, 0.0 }
  0x8b   :  { %373 = vmatmul.f32.vlgmr.msra.gmra.mxu2 %v321_v56  ;;  %v142_v57 = vpop.f32.mrf.mxu0 }
  0x8c   :  { %v256_v58 = vpop.f32.mrf.mxu1 }
  0x8d   :  { %v257_v59 = vadd.f32 %v256_v58, %v142_v57 }
  0x8f   :  { %v306_v60 = vadd.f32 %v787_v51, %v257_v59 }
  0x91   :  { %v322_v61 = vmax.f32 %v306_v60, 0.0 }
  0x93   :  { %376 = vmatmul.f32.gmra.mxu2 %v322_v61  ;;  %v145_v62 = vpop.f32.mrf.mxu0 }
  0x94   :  { %v259_v63 = vpop.f32.mrf.mxu1 }
  0x95   :  { %v260_v0 = vadd.f32 %v259_v63, %v145_v62 }
  0x97   :  { %v307_v1 = vadd.f32 %v787_v51, %v260_v0 }
  0x99   :  { %v323_v2 = vmax.f32 %v307_v1, 0.0 }
  0x9b   :  { %379 = vmatmul.f32.gmra.mxu2 %v323_v2  ;;  %v148_v3 = vpop.f32.mrf.mxu0 }
  0x9c   :  { %v262_v4 = vpop.f32.mrf.mxu1 }
  0x9d   :  { %v263_v5 = vadd.f32 %v262_v4, %v148_v3 }
  0x9f   :  { %v308_v6 = vadd.f32 %v787_v51, %v263_v5 }
  0xa1   :  { %v324_v7 = vmax.f32 %v308_v6, 0.0 }
  0xa3   :  { %382 = vmatmul.f32.gmra.mxu2 %v324_v7  ;;  %v151_v8 = vpop.f32.mrf.mxu0 }
  0xa4   :  { %v265_v9 = vpop.f32.mrf.mxu1 }
  0xa5   :  { %v266_v10 = vadd.f32 %v265_v9, %v151_v8 }
  0xa7   :  { %v309_v11 = vadd.f32 %v787_v51, %v266_v10 }
  0xa9   :  { %v325_v12 = vmax.f32 %v309_v11, 0.0 }
  0xab   :  { %385 = vmatmul.f32.gmra.mxu2 %v325_v12  ;;  %v154_v13 = vpop.f32.mrf.mxu0 }
  0xac   :  { %v268_v14 = vpop.f32.mrf.mxu1 }
  0xad   :  { %v269_v15 = vadd.f32 %v268_v14, %v154_v13 }
  0xaf   :  { %v310_v16 = vadd.f32 %v787_v51, %v269_v15 }
  0xb1   :  { %v326_v17 = vmax.f32 %v310_v16, 0.0 }
  0xb3   :  { %388 = vmatmul.f32.gmra.mxu2 %v326_v17  ;;  %v157_v18 = vpop.f32.mrf.mxu0 }
  0xb4   :  { %v271_v19 = vpop.f32.mrf.mxu1 }
  0xb5   :  { %v272_v20 = vadd.f32 %v271_v19, %v157_v18 }
  0xb7   :  { %v311_v21 = vadd.f32 %v787_v51, %v272_v20 }
  0xb9   :  { %v327_v22 = vmax.f32 %v311_v21, 0.0 }
  0xbb   :  { %391 = vmatmul.f32.gmra.mxu2 %v327_v22  ;;  %v160_v23 = vpop.f32.mrf.mxu0 }
  0xbc   :  { %v274_v24 = vpop.f32.mrf.mxu1 }
  0xbd   :  { %v275_v25 = vadd.f32 %v274_v24, %v160_v23 }
  0xbf   :  { %v312_v26 = vadd.f32 %v787_v51, %v275_v25 }
  0xc1   :  { %v328_v27 = vmax.f32 %v312_v26, 0.0 }
  0xc3   :  { %394 = vmatmul.f32.gmra.mxu2 %v328_v27  ;;  %v163_v28 = vpop.f32.mrf.mxu0 }
  0xc4   :  { %v277_v29 = vpop.f32.mrf.mxu1 }
  0xc5   :  { %v278_v30 = vadd.f32 %v277_v29, %v163_v28 }
  0xc7   :  { %v313_v31 = vadd.f32 %v787_v51, %v278_v30 }
  0xc9   :  { %v329_v32 = vmax.f32 %v313_v31, 0.0 }
  0xcb   :  { %397 = vmatmul.f32.gmra.mxu2 %v329_v32  ;;  %v166_v33 = vpop.f32.mrf.mxu0 }
  0xcc   :  { %v280_v34 = vpop.f32.mrf.mxu1 }
  0xcd   :  { %v281_v35 = vadd.f32 %v280_v34, %v166_v33 }
  0xcf   :  { %v314_v36 = vadd.f32 %v787_v51, %v281_v35 }
  0xd1   :  { %v330_v37 = vmax.f32 %v314_v36, 0.0 }
  0xd3   :  { %400 = vmatmul.f32.gmra.mxu2 %v330_v37  ;;  %v169_v38 = vpop.f32.mrf.mxu0 }
  0xd4   :  { %v283_v39 = vpop.f32.mrf.mxu1 }
  0xd5   :  { %v284_v40 = vadd.f32 %v283_v39, %v169_v38 }
  0xd7   :  { %v315_v41 = vadd.f32 %v787_v51, %v284_v40  ;;  %v439_v40 = vld [vmem:[#allocation2] sm:$0x1] }
  0xd9   :  { %v331_v42 = vmax.f32 %v315_v41, 0.0  ;;  %v547_v41 = vmov 0  }
  0xda   :  { %518 = vset.pattern.permute.xlu0 %v547_v41 }
  0xdb   :  { %403 = vmatmul.f32.gmra.mxu2 %v331_v42  ;;  %v172_v43 = vpop.f32.mrf.mxu0  ;;  %442 = vperm.xlu0 %518, %v439_v40  }
  0xdc   :  { %v286_v44 = vpop.f32.mrf.mxu1 }
  0xdd   :  { %v287_v45 = vadd.f32 %v286_v44, %v172_v43 }
  0xdf   :  { %v316_v46 = vadd.f32 %v787_v51, %v287_v45 }
  0xe1   :  { %v332_v47 = vmax.f32 %v316_v46, 0.0 }
  0xe3   :  { %406 = vmatmul.f32.gmra.mxu2 %v332_v47  ;;  %v175_v48 = vpop.f32.mrf.mxu0 }
  0xe4   :  { %v289_v49 = vpop.f32.mrf.mxu1 }
  0xe5   :  { %v290_v50 = vadd.f32 %v289_v49, %v175_v48 }
  0xe7   :  { %v317_v52 = vadd.f32 %v787_v51, %v290_v50 }
  0xe9   :  { %v333_v53 = vmax.f32 %v317_v52, 0.0 }
  0xeb   :  { %409 = vmatmul.f32.gmra.mxu2 %v333_v53  ;;  %v178_v54 = vpop.f32.mrf.mxu0 }
  0xec   :  { %v292_v55 = vpop.f32.mrf.mxu1 }
  0xed   :  { %v293_v56 = vadd.f32 %v292_v55, %v178_v54 }
  0xef   :  { %v318_v57 = vadd.f32 %v787_v51, %v293_v56  ;;  %v438_v56 = vld [vmem:[%s824_s7] sm:$0x1] }
  0xf1   :  { %v334_v58 = vmax.f32 %v318_v57, 0.0 }
  0xf3   :  { %412 = vmatmul.f32.gmra.mxu2 %v334_v58  ;;  %v181_v59 = vpop.f32.mrf.mxu0 }
  0xf4   :  { %v295_v60 = vpop.f32.mrf.mxu1 }
  0xf5   :  { %v296_v61 = vadd.f32 %v295_v60, %v181_v59 }
  0xf7   :  { %v319_v62 = vadd.f32 %v787_v51, %v296_v61 }
  0xf9   :  { %v335_v63 = vmax.f32 %v319_v62, 0.0 }
  0xfb   :  { %415 = vmatmul.f32.gmra.mxu2 %v335_v63  ;;  %v184_v0 = vpop.f32.mrf.mxu0 }
  0xfc   :  { %v298_v1 = vpop.f32.mrf.mxu1 }
  0xfd   :  { %v299_v2 = vadd.f32 %v298_v1, %v184_v0 }
  0xff   :  { %v320_v3 = vadd.f32 %v787_v51, %v299_v2  ;;  %v520_v51 = vld [vmem:[%s823_s6] ss:$0 sm:$0xff] }
 0x101   :  { %v336_v4 = vmax.f32 %v320_v3, 0.0 }
 0x103   :  { %418 = vmatmul.f32.gmra.mxu2 %v336_v4 }
 0x10e   :  { %v805_v5 = vpop.f32.mrf.mxu2 }
 0x10f   :  { %v375_v53 = vadd.f32 %v520_v51, %v805_v5 }
 0x111   :  { %v422_v55 = vmax.f32 %v375_v53, 0.0 }
 0x116   :  { %v377_v6 = vpop.f32.mrf.mxu2 }
 0x117   :  { %v378_v50 = vadd.f32 %v520_v51, %v377_v6 }
 0x119   :  { %v423_v54 = vmax.f32 %v378_v50, 0.0 }
 0x11e   :  { %v380_v7 = vpop.f32.mrf.mxu2 }
 0x11f   :  { %v381_v48 = vadd.f32 %v520_v51, %v380_v7 }
 0x121   :  { %v424_v52 = vmax.f32 %v381_v48, 0.0 }
 0x126   :  { %v383_v8 = vpop.f32.mrf.mxu2 }
 0x127   :  { %v384_v46 = vadd.f32 %v520_v51, %v383_v8 }
 0x129   :  { %v425_v49 = vmax.f32 %v384_v46, 0.0 }
 0x12e   :  { %v386_v9 = vpop.f32.mrf.mxu2 }
 0x12f   :  { %v387_v44 = vadd.f32 %v520_v51, %v386_v9 }
 0x131   :  { %v426_v47 = vmax.f32 %v387_v44, 0.0 }
 0x136   :  { %v389_v10 = vpop.f32.mrf.mxu2 }
 0x137   :  { %v390_v42 = vadd.f32 %v520_v51, %v389_v10 }
 0x139   :  { %v427_v45 = vmax.f32 %v390_v42, 0.0 }
 0x13e   :  { %v392_v11 = vpop.f32.mrf.mxu2 }
 0x13f   :  { %v393_v38 = vadd.f32 %v520_v51, %v392_v11 }
 0x141   :  { %v428_v43 = vmax.f32 %v393_v38, 0.0 }
 0x146   :  { %v395_v12 = vpop.f32.mrf.mxu2 }
 0x147   :  { %v396_v36 = vadd.f32 %v520_v51, %v395_v12 }
 0x149   :  { %v429_v39 = vmax.f32 %v396_v36, 0.0 }
 0x14d   :  { %v443_v57 = vpop.permute.xlu0 %442 }
 0x14e   :  { %v398_v13 = vpop.f32.mrf.mxu2  ;;  %v445_v58 = vperm.slane %v443_v57, 0 }
 0x14f   :  { %v399_v34 = vadd.f32 %v520_v51, %v398_v13 }
 0x151   :  { %v430_v37 = vmax.f32 %v399_v34, 0.0 }
 0x156   :  { %v401_v14 = vpop.f32.mrf.mxu2 }
 0x157   :  { %v402_v32 = vadd.f32 %v520_v51, %v401_v14 }
 0x159   :  { %v431_v35 = vmax.f32 %v402_v32, 0.0 }
 0x15e   :  { %v404_v15 = vpop.f32.mrf.mxu2 }
 0x15f   :  { %v405_v30 = vadd.f32 %v520_v51, %v404_v15 }
 0x161   :  { %v432_v33 = vmax.f32 %v405_v30, 0.0 }
 0x166   :  { %v407_v16 = vpop.f32.mrf.mxu2 }
 0x167   :  { %v408_v28 = vadd.f32 %v520_v51, %v407_v16 }
 0x169   :  { %v433_v31 = vmax.f32 %v408_v28, 0.0 }
 0x16e   :  { %v410_v17 = vpop.f32.mrf.mxu2 }
 0x16f   :  { %v411_v26 = vadd.f32 %v520_v51, %v410_v17 }
 0x171   :  { %v434_v29 = vmax.f32 %v411_v26, 0.0 }
 0x176   :  { %v413_v18 = vpop.f32.mrf.mxu2 }
 0x177   :  { %v414_v24 = vadd.f32 %v520_v51, %v413_v18 }
 0x179   :  { %v435_v27 = vmax.f32 %v414_v24, 0.0 }
 0x17e   :  { %v416_v19 = vpop.f32.mrf.mxu2 }
 0x17f   :  { %v417_v22 = vadd.f32 %v520_v51, %v416_v19 }
 0x181   :  { %v436_v25 = vmax.f32 %v417_v22, 0.0 }
 0x186   :  { %v419_v20 = vpop.f32.mrf.mxu2 }
 0x187   :  { %v420_v21 = vadd.f32 %v520_v51, %v419_v20 }
 0x189   :  { %v437_v23 = vmax.f32 %v420_v21, 0.0 }
 0x18b   :  { %446 = vmatpush.xpose.msra.mxu3 %v437_v23 }
 0x18f   :  { %447 = vmatpush.xpose.msra.mxu3 %v436_v25 }
 0x193   :  { %448 = vmatpush.xpose.msra.mxu3 %v435_v27 }
 0x197   :  { %449 = vmatpush.xpose.msra.mxu3 %v434_v29 }
 0x19b   :  { %450 = vmatpush.xpose.msra.mxu3 %v433_v31 }
 0x19f   :  { %451 = vmatpush.xpose.msra.mxu3 %v432_v33 }
 0x1a3   :  { %452 = vmatpush.xpose.msra.mxu3 %v431_v35 }
 0x1a7   :  { %453 = vmatpush.xpose.msra.mxu3 %v430_v37 }
 0x1ab   :  { %454 = vmatpush.xpose.msra.mxu3 %v429_v39 }
 0x1af   :  { %455 = vmatpush.xpose.msra.mxu3 %v428_v43 }
 0x1b3   :  { %456 = vmatpush.xpose.msra.mxu3 %v427_v45 }
 0x1b7   :  { %457 = vmatpush.xpose.msra.mxu3 %v426_v47 }
 0x1bb   :  { %458 = vmatpush.xpose.msra.mxu3 %v425_v49 }
 0x1bf   :  { %459 = vmatpush.xpose.msra.mxu3 %v424_v52 }
 0x1c3   :  { %460 = vmatpush.xpose.msra.mxu3 %v423_v54 }
 0x1c7   :  { %461 = vmatpush.xpose.msra.mxu3 %v422_v55 }
 0x1ca   :  { %462 = vmatmul.f32.vlgmr.msra.gmra.mxu3 %v438_v56 }
 0x24d   :  { %v463_v59 = vpop.f32.mrf.mxu3 }
 0x24e   :  { %v464_v60 = vadd.f32 %v463_v59, %v445_v58 }
 0x250   :  { %466 = vst [vmem:[#allocation3] sm:$0x1] %v464_v60 }
 0x251   :  { %477 = dma.vmem_to_hbm [thread:$0]  %s473_s17, 16, %s475_s8, [#allocation4]  }
 0x252   :  { %545 = dma.done.wait [#allocation4], 16  }
 0x253   :  { %546 = vsyncadd [#allocation4], 4294967280 }
 0x254   :  { %482 = vsyncpa [#allocation4], 1 }

</bundles_post_ra>
